<compile_context>
chip_gen: v5e
topology: v5e:2x2
jax: 0.10.0
libtpu: 0.0.40
codegen_flags: <defaults>
</compile_context>

<pallas_src>
import functools

import jax
import jax.numpy as jnp
from jax import lax
from jax.experimental import pallas as pl
from jax.experimental.pallas import tpu as pltpu


def _round_up(a, b):
    return (a + b - 1) // b * b


def _cdiv(a, b):
    return (a + b - 1) // b


def _online_softmax_step(qb, e_tile, m, l, acc, col_mask=None):
    """One flash-style online-softmax update over a (TV, D) slice of E."""
    # s = q @ E_tile^T, contraction expressed directly on D (no transposed E materialized).
    s = lax.dot_general(
        qb, e_tile,
        dimension_numbers=(((1,), (1,)), ((), ())),
        preferred_element_type=jnp.float32)                       # (TM, TV) f32
    if col_mask is not None:
        s = jnp.where(col_mask, s, jnp.float32(-1e30))
    m_new = jnp.maximum(m, jnp.max(s, axis=-1, keepdims=True))
    alpha = jnp.exp(m - m_new)
    p = jnp.exp(s - m_new)
    l_new = alpha * l + jnp.sum(p, axis=-1, keepdims=True)
    acc_new = alpha * acc + jnp.dot(
        p.astype(jnp.bfloat16), e_tile, preferred_element_type=jnp.float32)
    return m_new, l_new, acc_new


# --------------------------------------------------------------------------------------
# Main path: E (and W) fully resident in VMEM, 1-D grid over row tiles.
# --------------------------------------------------------------------------------------
def sde_kernel_resident(x_ref, w_ref, e_ref, o_ref, *, v, tv):
    # x_ref: (TM, C) bf16   w_ref: (C, D) bf16 (resident)   e_ref: (Vp, D) bf16 (resident)
    # o_ref: (TM, D) out dtype
    tm = x_ref.shape[0]
    d = w_ref.shape[1]
    vp = e_ref.shape[0]
    n_tiles = vp // tv
    has_pad = (v % tv) != 0
    n_unmasked = n_tiles - 1 if has_pad else n_tiles   # only the last tile holds padding

    # charEmbedder: q = tanh(x @ W) — once per row tile; cast to bf16 once for the MXU.
    q = jnp.tanh(jnp.dot(x_ref[...], w_ref[...], preferred_element_type=jnp.float32))
    qb = q.astype(jnp.bfloat16)

    m0 = jnp.full((tm, 1), -jnp.inf, dtype=jnp.float32)
    l0 = jnp.zeros((tm, 1), dtype=jnp.float32)
    a0 = jnp.zeros((tm, d), dtype=jnp.float32)

    def body(t, carry):
        m, l, acc = carry
        off = pl.multiple_of(t * tv, tv)
        e_tile = e_ref[pl.ds(off, tv), :]
        return _online_softmax_step(qb, e_tile, m, l, acc)

    if n_unmasked > 0:
        m, l, acc = lax.fori_loop(0, n_unmasked, body, (m0, l0, a0),
                                  unroll=(n_unmasked <= 8))
    else:
        m, l, acc = m0, l0, a0

    if has_pad:
        # Mask padded vocab columns on the final tile only (static branch, zero cost on
        # interior tiles).
        e_tile = e_ref[pl.ds(n_unmasked * tv, tv), :]
        col = n_unmasked * tv + lax.broadcasted_iota(jnp.int32, (tm, tv), 1)
        m, l, acc = _online_softmax_step(qb, e_tile, m, l, acc, col_mask=col < v)

    # Exact normalization + residual (once per row tile -> negligible cost).
    o_ref[...] = (acc / l + q).astype(o_ref.dtype)


# --------------------------------------------------------------------------------------
# Fallback path: V streamed over a grid axis (for vocabularies too large to hold E in VMEM).
# --------------------------------------------------------------------------------------
def sde_kernel_streamed(x_ref, w_ref, e_ref, o_ref,
                        q_sc, qb_sc, m_sc, l_sc, acc_sc, *, v, tv):
    # x_ref: (TM, C) bf16   w_ref: (C, D) bf16 (resident)   e_ref: (TV, D) bf16
    kv = pl.program_id(1)
    tm, d = acc_sc.shape

    @pl.when(kv == 0)
    def _():
        q = jnp.tanh(jnp.dot(x_ref[...], w_ref[...], preferred_element_type=jnp.float32))
        q_sc[...] = q                                   # f32 residual
        qb_sc[...] = q.astype(jnp.bfloat16)             # bf16 MXU operand, cast once
        m_sc[...] = jnp.full_like(m_sc[...], -jnp.inf)
        l_sc[...] = jnp.zeros_like(l_sc[...])
        acc_sc[...] = jnp.zeros_like(acc_sc[...])

    col_mask = None
    if v % tv != 0:
        col = kv * tv + lax.broadcasted_iota(jnp.int32, (tm, tv), 1)
        col_mask = col < v

    m, l, acc = _online_softmax_step(
        qb_sc[...], e_ref[...], m_sc[...], l_sc[...], acc_sc[...], col_mask)
    m_sc[...] = m
    l_sc[...] = l
    acc_sc[...] = acc

    @pl.when(kv == pl.num_programs(1) - 1)
    def _():
        o_ref[...] = (acc_sc[...] / l_sc[...] + q_sc[...]).astype(o_ref.dtype)


def sde_embedding(tokens, w_proj, emb_matrix, *, tm=512, tv=2048, force_stream=False):
    """tokens: [B, L, C] f32, w_proj: [C, D] f32 (pre-transposed nn.Linear weight),
    emb_matrix: [V, D] f32 -> [B, L, D] (tokens.dtype)."""
    B, L, C = tokens.shape
    Cw, D = w_proj.shape
    V, Dv = emb_matrix.shape
    assert Cw == C and Dv == D

    M = B * L

    # Row tiling: default 512 rows (keeps the kernel MXU-bound on v6e), >=128 rows (MXU
    # passes are 128/256 rows wide regardless), multiple of 16 (bf16 sublane packing), and
    # at least 2 tiles when M allows so the "parallel" axis feeds both v7x TensorCores.
    n_row_tiles = max(1, _cdiv(M, tm))
    if n_row_tiles == 1 and M >= 256:
        n_row_tiles = 2
    TM = max(128, _round_up(_cdiv(M, n_row_tiles), 16))
    if n_row_tiles > 1:
        TM = _round_up(TM, 128)
    Mp = _round_up(M, TM)

    # Vocab tiling for the online softmax (inner loop / kv grid axis).
    TV = min(tv, max(128, _round_up(V, 16)))
    Vp = _round_up(V, TV)

    # Explicit VMEM budget (~75% of physical: ~96 MiB on v5e/v6e, ~48 MiB on v7x).
    try:
        vmem_cap = pltpu.get_tpu_info().vmem_capacity_bytes
    except Exception:
        vmem_cap = 64 * 1024 * 1024
    vmem_limit = int(vmem_cap * 0.75)

    # Rough VMEM estimate for the resident path: resident E + resident W + double-buffered
    # x/out blocks + s/p temporaries + q/acc working set.
    f32 = 4
    resident_est = (
        Vp * D * 2 + C * D * 2                     # E, W resident (bf16, single copy)
        + 2 * TM * C * 2 + 2 * TM * D * f32        # x block (bf16) + out block, double-buffered
        + 2 * TM * TV * f32                        # s, p temporaries
        + 3 * TM * D * f32                         # q, qb, acc working set (upper bound)
    )
    use_resident = (not force_stream) and (resident_est <= vmem_limit)

    # Flatten rows, cast MXU operands to bf16 (halves DMA/VMEM for E and W).
    x = tokens.reshape(M, C).astype(jnp.bfloat16)
    if Mp != M:
        x = jnp.pad(x, ((0, Mp - M), (0, 0)))
    w = w_proj.astype(jnp.bfloat16)
    e = emb_matrix.astype(jnp.bfloat16)
    if Vp != V:
        e = jnp.pad(e, ((0, Vp - V), (0, 0)))

    out_dtype = tokens.dtype

    if use_resident:
        kernel = functools.partial(sde_kernel_resident, v=V, tv=TV)
        out = pl.pallas_call(
            kernel,
            out_shape=jax.ShapeDtypeStruct((Mp, D), out_dtype),
            grid_spec=pltpu.PrefetchScalarGridSpec(
                num_scalar_prefetch=0,
                grid=(Mp // TM,),
                in_specs=[
                    pl.BlockSpec((TM, C), lambda i: (i, 0)),
                    pl.BlockSpec(memory_space=pltpu.MemorySpace.VMEM),  # W resident, 1 copy
                    pl.BlockSpec(memory_space=pltpu.MemorySpace.VMEM),  # E resident, 1 copy
                ],
                out_specs=pl.BlockSpec((TM, D), lambda i: (i, 0)),
            ),
            compiler_params=pltpu.CompilerParams(
                dimension_semantics=("parallel",),
                vmem_limit_bytes=vmem_limit),
        )(x, w, e)
    else:
        kernel = functools.partial(sde_kernel_streamed, v=V, tv=TV)
        out = pl.pallas_call(
            kernel,
            out_shape=jax.ShapeDtypeStruct((Mp, D), out_dtype),
            grid_spec=pltpu.PrefetchScalarGridSpec(
                num_scalar_prefetch=0,
                grid=(Mp // TM, Vp // TV),
                in_specs=[
                    pl.BlockSpec((TM, C), lambda i, kv: (i, 0)),
                    pl.BlockSpec(memory_space=pltpu.MemorySpace.VMEM),  # W resident, 1 copy
                    pl.BlockSpec((TV, D), lambda i, kv: (kv, 0)),       # E streamed over kv
                ],
                out_specs=pl.BlockSpec((TM, D), lambda i, kv: (i, 0)),
                scratch_shapes=[
                    pltpu.VMEM((TM, D), jnp.float32),    # q (f32, residual)
                    pltpu.VMEM((TM, D), jnp.bfloat16),   # q (bf16 MXU operand, cast once)
                    pltpu.VMEM((TM, 1), jnp.float32),    # running max
                    pltpu.VMEM((TM, 1), jnp.float32),    # running sum
                    pltpu.VMEM((TM, D), jnp.float32),    # ctx accumulator
                ],
            ),
            compiler_params=pltpu.CompilerParams(
                dimension_semantics=("parallel", "arbitrary"),
                vmem_limit_bytes=vmem_limit),
        )(x, w, e)

    return out[:M].reshape(B, L, D)


def reference(tokens, w_proj, emb_matrix):
    q = jnp.tanh(jnp.einsum("blc,cd->bld", tokens, w_proj))
    s = jnp.einsum("bld,vd->blv", q, emb_matrix)
    p = jax.nn.softmax(s, axis=-1)
    return jnp.einsum("blv,vd->bld", p, emb_matrix) + q


if __name__ == "__main__":
    # Small shapes consistent with the module: char_vsize=C, d_vec=D, vocab_size=V
    B, L, C, D, V = 2, 8, 128, 128, 256

    key = jax.random.PRNGKey(0)
    k_tok, k_w, k_e = jax.random.split(key, 3)

    # Densified sparse char-ngram count features (non-negative, sparse-ish).
    tokens = (jax.random.uniform(k_tok, (B, L, C), jnp.float32) > 0.8).astype(jnp.float32)

    # nn.Linear(char_vsize, d_vec, bias=False): weight [D, C]; kernel takes it transposed.
    bound = 1.0 / (C ** 0.5)
    w_torch_layout = jax.random.uniform(k_w, (D, C), jnp.float32, -bound, bound)
    w_proj = w_torch_layout.T                      # [C, D]

    # QueryEmb.emb_matrix: ones(V, D).uniform_(-0.1, 0.1)
    emb_matrix = jax.random.uniform(k_e, (V, D), jnp.float32, -0.1, 0.1)

    ref = reference(tokens, w_proj, emb_matrix)

    # Main (VMEM-resident E) path.
    out = sde_embedding(tokens, w_proj, emb_matrix)
    out = jax.block_until_ready(out)
    assert out.shape == (B, L, D)
    # bf16 MXU operands => looser tolerance than pure f32.
    assert jnp.allclose(out, ref, atol=2e-2, rtol=2e-2), float(jnp.max(jnp.abs(out - ref)))

    # Streamed-E fallback path (used for vocabularies too large to hold E in VMEM).
    out_s = sde_embedding(tokens, w_proj, emb_matrix, force_stream=True)
    out_s = jax.block_until_ready(out_s)
    assert jnp.allclose(out_s, ref, atol=2e-2, rtol=2e-2), float(jnp.max(jnp.abs(out_s - ref)))

    print("KERNEL_OK")
</pallas_src>

<mosaic_0001>
module attributes {stable_mosaic.version = 11 : i64} {
  func.func @sde_kernel_resident(%arg0: i32, %arg1: memref<128x128xbf16, #tpu.memory_space<vmem>>, %arg2: memref<128x128xbf16, #tpu.memory_space<vmem>>, %arg3: memref<256x128xbf16, #tpu.memory_space<vmem>>, %arg4: memref<128x128xf32, #tpu.memory_space<vmem>>) attributes {dimension_semantics = [#tpu.dimension_semantics<parallel>], iteration_bounds = array<i64: 1>, scalar_prefetch = 0 : i64, scratch_operands = 0 : i64, tpu.core_type = #tpu.core_type<tc>, window_params = [{transform_indices = @transform_0, window_bounds = array<i64: 128, 128>}, {pipeline_mode = #tpu.pipeline_mode<synchronous>, transform_indices = @transform_1, window_bounds = array<i64: 128, 128>}, {pipeline_mode = #tpu.pipeline_mode<synchronous>, transform_indices = @transform_2, window_bounds = array<i64: 256, 128>}, {transform_indices = @transform_3, window_bounds = array<i64: 128, 128>}]} {
    %c0 = arith.constant 0 : index
    %c0_0 = arith.constant 0 : index
    %0 = vector.load %arg1[%c0, %c0_0] : memref<128x128xbf16, #tpu.memory_space<vmem>>, vector<128x128xbf16>
    %c0_1 = arith.constant 0 : index
    %c0_2 = arith.constant 0 : index
    %1 = vector.load %arg2[%c0_1, %c0_2] : memref<128x128xbf16, #tpu.memory_space<vmem>>, vector<128x128xbf16>
    %cst = arith.constant dense<0.000000e+00> : vector<128x128xf32>
    %2 = tpu.matmul %0, %1, %cst {dimension_numbers = #tpu.dot_dimension_numbers<[1], [0], [0], [1], [0, 0, 1, 1], [], []>} : vector<128x128xbf16>, vector<128x128xbf16>, vector<128x128xf32> -> vector<128x128xf32>
    %3 = math.tanh %2 : vector<128x128xf32>
    %4 = arith.truncf %3 : vector<128x128xf32> to vector<128x128xbf16>
    %cst_3 = arith.constant 0xFF800000 : f32
    %5 = vector.broadcast %cst_3 : f32 to vector<128x1xf32>
    %cst_4 = arith.constant 0.000000e+00 : f32
    %6 = vector.broadcast %cst_4 : f32 to vector<128x1xf32>
    %cst_5 = arith.constant 0.000000e+00 : f32
    %7 = vector.broadcast %cst_5 : f32 to vector<128x128xf32>
    %c0_i32 = arith.constant 0 : i32
    %c256_i32 = arith.constant 256 : i32
    %8 = arith.muli %c0_i32, %c256_i32 : i32
    %9 = tpu.assume_multiple %8, 256 : i32
    %10 = arith.index_cast %9 : i32 to index
    %c0_6 = arith.constant 0 : index
    %11 = vector.load %arg3[%10, %c0_6] : memref<256x128xbf16, #tpu.memory_space<vmem>>, vector<256x128xbf16>
    %cst_7 = arith.constant dense<0.000000e+00> : vector<128x256xf32>
    %12 = tpu.matmul %4, %11, %cst_7 {dimension_numbers = #tpu.dot_dimension_numbers<[1], [1], [0], [0], [0, 0, 1, 0], [], []>} : vector<128x128xbf16>, vector<256x128xbf16>, vector<128x256xf32> -> vector<128x256xf32>
    %cst_8 = arith.constant dense<0xFF800000> : vector<128xf32>
    %13 = vector.multi_reduction <maximumf>, %12, %cst_8 [1] : vector<128x256xf32> to vector<128xf32>
    %14 = vector.shape_cast %13 : vector<128xf32> to vector<128x1xf32>
    %15 = arith.maximumf %5, %14 : vector<128x1xf32>
    %16 = arith.subf %5, %15 : vector<128x1xf32>
    %17 = math.exp %16 : vector<128x1xf32>
    %18 = vector.broadcast %15 : vector<128x1xf32> to vector<128x256xf32>
    %19 = arith.subf %12, %18 : vector<128x256xf32>
    %20 = math.exp %19 : vector<128x256xf32>
    %21 = arith.mulf %17, %6 : vector<128x1xf32>
    %cst_9 = arith.constant dense<0.000000e+00> : vector<128xf32>
    %22 = vector.multi_reduction <add>, %20, %cst_9 [1] : vector<128x256xf32> to vector<128xf32>
    %23 = vector.shape_cast %22 : vector<128xf32> to vector<128x1xf32>
    %24 = arith.addf %21, %23 : vector<128x1xf32>
    %25 = vector.broadcast %17 : vector<128x1xf32> to vector<128x128xf32>
    %26 = arith.mulf %25, %7 : vector<128x128xf32>
    %27 = arith.truncf %20 : vector<128x256xf32> to vector<128x256xbf16>
    %cst_10 = arith.constant dense<0.000000e+00> : vector<128x128xf32>
    %28 = tpu.matmul %27, %11, %cst_10 {dimension_numbers = #tpu.dot_dimension_numbers<[1], [0], [0], [1], [0, 0, 1, 1], [], []>} : vector<128x256xbf16>, vector<256x128xbf16>, vector<128x128xf32> -> vector<128x128xf32>
    %29 = arith.addf %26, %28 : vector<128x128xf32>
    %c1_i32 = arith.constant 1 : i32
    %30 = vector.broadcast %24 : vector<128x1xf32> to vector<128x128xf32>
    %31 = arith.divf %29, %30 : vector<128x128xf32>
    %32 = arith.addf %31, %3 : vector<128x128xf32>
    %c0_11 = arith.constant 0 : index
    %c0_12 = arith.constant 0 : index
    %33 = vector.load %arg4[%c0_11, %c0_12] : memref<128x128xf32, #tpu.memory_space<vmem>>, vector<128x128xf32>
    tpu.vector_store %arg4[%c0_11, %c0_12], %32 {strides = array<i32>} : memref<128x128xf32, #tpu.memory_space<vmem>>, vector<128x128xf32>,
    return
  }
  func.func @transform_0(%arg0: i32) -> (i32, i32) {
    %c0_i32 = arith.constant 0 : i32
    %c0_i32_0 = arith.constant 0 : i32
    return %arg0, %c0_i32 : i32, i32
  }
  func.func @transform_1(%arg0: i32) -> (i32, i32) {
    %c0_i32 = arith.constant 0 : i32
    %c0_i32_0 = arith.constant 0 : i32
    %c0_i32_1 = arith.constant 0 : i32
    return %c0_i32, %c0_i32_0 : i32, i32
  }
  func.func @transform_2(%arg0: i32) -> (i32, i32) {
    %c0_i32 = arith.constant 0 : i32
    %c0_i32_0 = arith.constant 0 : i32
    %c0_i32_1 = arith.constant 0 : i32
    return %c0_i32, %c0_i32_0 : i32, i32
  }
  func.func @transform_3(%arg0: i32) -> (i32, i32) {
    %c0_i32 = arith.constant 0 : i32
    %c0_i32_0 = arith.constant 0 : i32
    return %arg0, %c0_i32 : i32, i32
  }
}

</mosaic_0001>

<bundles_post_ra>
// kernel: tpu_custom_call.1
= control target key start
LH: loop header
LB: loop body
LE: loop exit
PB: predicated region body
PF: predicated region fallthrough
CT: control target
= control target key end

     0   :  { %8 = vsyncpa [#allocation3], 0  ;;  %s2229_s0 = inlined_call_operand.hbm [shape: bf16[128,128], index: 0, kind: input, shape index: {}]   ;;  %s2230_s1 = inlined_call_operand.hbm [shape: bf16[128,128], index: 1, kind: input, shape index: {}]   ;;  %s2231_s2 = inlined_call_operand.hbm [shape: bf16[256,128], index: 2, kind: input, shape index: {}]   ;;  %s2232_s3 = inlined_call_operand.hbm [shape: f32[128,128], index: 3, kind: output, shape index: {}]  }
   0x1   :  { %9 = vsyncpa [#allocation6], 0 }
   0x2   :  { %10 = vsyncpa [#allocation4], 0  ;;  %s28_s14 = sshll.u32 %s2230_s1, 4  ;;  %s1629_s15 = smov [#allocation5]   ;;  %s29_s14 = int_to_ptr.hbm [resolvable:$true] %s28_s14 }
   0x3   :  { %s30_s16 = sshll.u32 %s1629_s15, 4  ;;  %s15_s19 = sshll.u32 %s2229_s0, 4  ;;  %s31_s16 = int_to_ptr.vmem [resolvable:$true] %s30_s16  ;;  %s16_s19 = int_to_ptr.hbm [resolvable:$true] %s15_s19 }
   0x4   :  { %s1630_s20 = smov 64   ;;  %s1631_s21 = smov 4  }
   0x5   :  { %36 = dma.hbm_to_vmem [thread:$0]  %s29_s14, 1024, %s31_s16, [#allocation6], %s1630_s20, %s1630_s20, %s1631_s21  }
   0x6   :  { %s1632_s22 = smov [#allocation2]   ;;  %s41_s26 = sshll.u32 %s2231_s2, 4  ;;  %s42_s26 = int_to_ptr.hbm [resolvable:$true] %s41_s26 }
   0x7   :  { %s17_s23 = sshll.u32 %s1632_s22, 4  ;;  %s1633_s1 = smov [#allocation7]   ;;  %s18_s23 = int_to_ptr.vmem [resolvable:$true] %s17_s23 }
   0x8   :  { %23 = dma.hbm_to_vmem [thread:$0]  %s16_s19, 1024, %s18_s23, [#allocation3], %s1630_s20, %s1630_s20, %s1631_s21  }
   0x9   :  { %s43_s27 = sshll.u32 %s1633_s1, 4  ;;  %s44_s27 = int_to_ptr.vmem [resolvable:$true] %s43_s27 }
   0xa   :  { %49 = dma.hbm_to_vmem [thread:$0]  %s42_s26, 2048, %s44_s27, [#allocation6], %s1630_s20, %s1630_s20, %s1631_s21  }
   0xb   :  { %1623 = dma.done.wait [#allocation3], 1024  }
   0xc   :  { %1624 = vsyncadd [#allocation3], 4294966272 }
   0xd   :  { %1625 = dma.done.wait [#allocation6], 3072  }
   0xe   :  { %1626 = vsyncadd [#allocation6], 4294964224  ;;  %v1326_v0 = vld [vmem:[#allocation5 + $0x38] sm:$0xff]  ;;  %v1325_v1 = vld [vmem:[#allocation5 + $0x30] sm:$0xff]  ;;  %s1634_s0 = smov [#allocation8]   ;;  %s1169_s30 = sshll.u32 %s2232_s3, 4  ;;  %s1170_s30 = int_to_ptr.hbm [resolvable:$true] %s1169_s30 }
   0xf   :  { %190 = vmatpush.bf16.msra.mxu0 %v1326_v0  ;;  %1343 = vmatpush.bf16.msra.mxu1 %v1326_v0  ;;  %v1324_v2 = vld [vmem:[#allocation5 + $0x28] sm:$0xff]  ;;  %v1323_v3 = vld [vmem:[#allocation5 + $0x20] sm:$0xff]  ;;  %v1322_v4 = vld [vmem:[#allocation5 + $0x18] sm:$0xff]  ;;  %s1167_s2 = sshll.u32 %s1634_s0, 4  ;;  %s1635_s4 = smov 128   ;;  %s1168_s2 = int_to_ptr.vmem [resolvable:$true] %s1167_s2 }
  0x10   :  { %1344 = vmatpush.bf16.msra.mxu3 %v1326_v0  ;;  %v1321_v5 = vld [vmem:[#allocation5 + $0x10] sm:$0xff]  ;;  %v1320_v6 = vld [vmem:[#allocation5 + $0x8] sm:$0xff]  ;;  %v1319_v7 = vld [vmem:[#allocation5] sm:$0xff]  ;;  %s1636_s5 = smov 8  }
  0x11   :  { %v1311_v8 = vld [vmem:[#allocation2] sm:$0xff]  ;;  %v1314_v9 = vld [vmem:[#allocation2 + $0x18] sm:$0xff]  ;;  %v1317_v12 = vld [vmem:[#allocation2 + $0x30] sm:$0xff] }
  0x12   :  { %v1334_v10 = vld [vmem:[#allocation7 + $0x38] sm:$0xff]  ;;  %v1341_v13 = vld [vmem:[#allocation7 + $0x70] sm:$0xff]  ;;  %v1340_v15 = vld [vmem:[#allocation7 + $0x68] sm:$0xff] }
  0x13   :  { %191 = vmatpush.bf16.msra.mxu0 %v1325_v1  ;;  %1345 = vmatpush.bf16.msra.mxu1 %v1325_v1  ;;  %v1342_v11 = vld [vmem:[#allocation7 + $0x78] sm:$0xff]  ;;  %v1333_v14 = vld [vmem:[#allocation7 + $0x30] sm:$0xff]  ;;  %v1312_v16 = vld [vmem:[#allocation2 + $0x8] sm:$0xff] }
  0x14   :  { %1346 = vmatpush.bf16.msra.mxu3 %v1325_v1  ;;  %440 = vmatpush.bf16.xpose.msra.mxu2 %v1342_v11  ;;  %v1332_v17 = vld [vmem:[#allocation7 + $0x28] sm:$0xff]  ;;  %v1315_v18 = vld [vmem:[#allocation2 + $0x20] sm:$0xff]  ;;  %v1318_v21 = vld [vmem:[#allocation2 + $0x38] sm:$0xff] }
  0x15   :  { %v1339_v19 = vld [vmem:[#allocation7 + $0x60] sm:$0xff]  ;;  %v1338_v22 = vld [vmem:[#allocation7 + $0x58] sm:$0xff]  ;;  %v1337_v24 = vld [vmem:[#allocation7 + $0x50] sm:$0xff] }
  0x16   :  { %v1331_v20 = vld [vmem:[#allocation7 + $0x20] sm:$0xff]  ;;  %v1330_v23 = vld [vmem:[#allocation7 + $0x18] sm:$0xff]  ;;  %v1329_v25 = vld [vmem:[#allocation7 + $0x10] sm:$0xff] }
  0x17   :  { %192 = vmatpush.bf16.msra.mxu0 %v1324_v2  ;;  %1347 = vmatpush.bf16.msra.mxu1 %v1324_v2  ;;  %v1313_v26 = vld [vmem:[#allocation2 + $0x10] sm:$0xff]  ;;  %v1316_v27 = vld [vmem:[#allocation2 + $0x28] sm:$0xff]  ;;  %v1327_v30 = vld [vmem:[#allocation7] sm:$0xff] }
  0x18   :  { %1348 = vmatpush.bf16.msra.mxu3 %v1324_v2  ;;  %v1328_v28 = vld [vmem:[#allocation7 + $0x8] sm:$0xff]  ;;  %v1335_v31 = vld [vmem:[#allocation7 + $0x40] sm:$0xff] }
  0x19   :  { %v1336_v29 = vld [vmem:[#allocation7 + $0x48] sm:$0xff] }
  0x1b   :  { %193 = vmatpush.bf16.msra.mxu0 %v1323_v3  ;;  %1349 = vmatpush.bf16.msra.mxu1 %v1323_v3 }
  0x1c   :  { %1350 = vmatpush.bf16.msra.mxu3 %v1323_v3  ;;  %441 = vmatpush.bf16.xpose.msra.mxu2 %v1341_v13 }
  0x1f   :  { %194 = vmatpush.bf16.msra.mxu0 %v1322_v4  ;;  %1351 = vmatpush.bf16.msra.mxu1 %v1322_v4 }
  0x20   :  { %1352 = vmatpush.bf16.msra.mxu3 %v1322_v4 }
  0x23   :  { %195 = vmatpush.bf16.msra.mxu0 %v1321_v5  ;;  %1353 = vmatpush.bf16.msra.mxu1 %v1321_v5 }
  0x24   :  { %1354 = vmatpush.bf16.msra.mxu3 %v1321_v5  ;;  %442 = vmatpush.bf16.xpose.msra.mxu2 %v1340_v15 }
  0x27   :  { %196 = vmatpush.bf16.msra.mxu0 %v1320_v6  ;;  %1355 = vmatpush.bf16.msra.mxu1 %v1320_v6 }
  0x28   :  { %1356 = vmatpush.bf16.msra.mxu3 %v1320_v6 }
  0x2b   :  { %197 = vmatpush.bf16.msra.mxu0 %v1319_v7  ;;  %1357 = vmatpush.bf16.msra.mxu1 %v1319_v7 }
  0x2c   :  { %1358 = vmatpush.bf16.msra.mxu3 %v1319_v7  ;;  %443 = vmatpush.bf16.xpose.msra.mxu2 %v1339_v19 }
  0x2e   :  { %198 = vmatmul.bf16.vlgmr.msra.gmra.mxu0 %v1311_v8  ;;  %213 = vmatmul.bf16.vlgmr.msra.gmra.mxu1 %v1314_v9 }
  0x2f   :  { %391 = vmatpush.bf16.xpose.msrb.mxu1 %v1334_v10  ;;  %228 = vmatmul.bf16.vlgmr.msra.gmra.mxu3 %v1317_v12 }
  0x30   :  { %826 = vmatpush.bf16.msrb.mxu0 %v1342_v11  ;;  %777 = vmatpush.bf16.msrb.mxu3 %v1334_v10 }
  0x34   :  { %827 = vmatpush.bf16.msrb.mxu0 %v1341_v13  ;;  %778 = vmatpush.bf16.msrb.mxu3 %v1333_v14 }
  0x35   :  { %444 = vmatpush.bf16.xpose.msra.mxu2 %v1338_v22 }
  0x37   :  { %392 = vmatpush.bf16.xpose.msrb.mxu1 %v1333_v14 }
  0x38   :  { %828 = vmatpush.bf16.msrb.mxu0 %v1340_v15  ;;  %779 = vmatpush.bf16.msrb.mxu3 %v1332_v17 }
  0x3c   :  { %829 = vmatpush.bf16.msrb.mxu0 %v1339_v19  ;;  %780 = vmatpush.bf16.msrb.mxu3 %v1331_v20 }
  0x3d   :  { %445 = vmatpush.bf16.xpose.msra.mxu2 %v1337_v24 }
  0x3e   :  { %203 = vmatmul.bf16.gmra.mxu0 %v1312_v16  ;;  %218 = vmatmul.bf16.gmra.mxu1 %v1315_v18 }
  0x3f   :  { %393 = vmatpush.bf16.xpose.msrb.mxu1 %v1332_v17  ;;  %233 = vmatmul.bf16.gmra.mxu3 %v1318_v21 }
  0x40   :  { %830 = vmatpush.bf16.msrb.mxu0 %v1338_v22  ;;  %781 = vmatpush.bf16.msrb.mxu3 %v1330_v23 }
  0x44   :  { %831 = vmatpush.bf16.msrb.mxu0 %v1337_v24  ;;  %782 = vmatpush.bf16.msrb.mxu3 %v1329_v25 }
  0x45   :  { %446 = vmatpush.bf16.xpose.msra.mxu2 %v1336_v29 }
  0x47   :  { %394 = vmatpush.bf16.xpose.msrb.mxu1 %v1331_v20 }
  0x48   :  { %783 = vmatpush.bf16.msrb.mxu3 %v1328_v28  ;;  %832 = vmatpush.bf16.msrb.mxu0 %v1336_v29 }
  0x4c   :  { %784 = vmatpush.bf16.msrb.mxu3 %v1327_v30  ;;  %833 = vmatpush.bf16.msrb.mxu0 %v1335_v31 }
  0x4d   :  { %447 = vmatpush.bf16.xpose.msra.mxu2 %v1335_v31 }
  0x4e   :  { %208 = vmatmul.bf16.gmra.mxu0 %v1313_v26  ;;  %223 = vmatmul.bf16.gmra.mxu1 %v1316_v27 }
  0x4f   :  { %395 = vmatpush.bf16.xpose.msrb.mxu1 %v1330_v23 }
  0x57   :  { %396 = vmatpush.bf16.xpose.msrb.mxu1 %v1329_v25 }
  0x5f   :  { %397 = vmatpush.bf16.xpose.msrb.mxu1 %v1328_v28 }
  0x67   :  { %398 = vmatpush.bf16.xpose.msrb.mxu1 %v1327_v30 }
  0xab   :  { %v199_v32 = vpop.f32.mrf.mxu0  ;;  %v214_v43 = vpop.f32.mrf.mxu1 }
  0xac   :  { %1367 = vtanh.f32 %v199_v32 }
  0xb2   :  { %v1666_v34 = vpop.eup %1367  ;;  %v229_v59 = vpop.f32.mrf.mxu3 }
  0xb3   :  { %v201_v33 = vpop.f32.mrf.mxu0  ;;  %v216_v45 = vpop.f32.mrf.mxu1 }
  0xb4   :  { %1369 = vtanh.f32 %v201_v33 }
  0xba   :  { %v1668_v35 = vpop.eup %1369  ;;  %v231_v62 = vpop.f32.mrf.mxu3 }
  0xbb   :  { %v204_v36 = vpop.f32.mrf.mxu0  ;;  %v255_v37 = vpack.c.bf16 %v1668_v35, %v1666_v34  ;;  %v219_v49 = vpop.f32.mrf.mxu1 }
  0xbc   :  { %1371 = vtanh.f32 %v204_v36 }
  0xbd   :  { %399 = vmatmul.bf16.vlgmr.msrb.gmra.mxu1 %v255_v37  ;;  %448 = vmatmul.bf16.vlgmr.msra.gmra.mxu2 %v255_v37 }
  0xc2   :  { %v1672_v39 = vpop.eup %1371  ;;  %v234_v0 = vpop.f32.mrf.mxu3 }
  0xc3   :  { %v206_v38 = vpop.f32.mrf.mxu0  ;;  %v221_v52 = vpop.f32.mrf.mxu1 }
  0xc4   :  { %1373 = vtanh.f32 %v206_v38 }
  0xca   :  { %v1674_v40 = vpop.eup %1373  ;;  %v236_v4 = vpop.f32.mrf.mxu3 }
  0xcb   :  { %v209_v41 = vpop.f32.mrf.mxu0  ;;  %v256_v42 = vpack.c.bf16 %v1674_v40, %v1672_v39  ;;  %v224_v54 = vpop.f32.mrf.mxu1 }
  0xcc   :  { %1375 = vtanh.f32 %v209_v41 }
  0xcd   :  { %404 = vmatmul.bf16.gmra.mxu1 %v256_v42  ;;  %453 = vmatmul.bf16.gmra.mxu2 %v256_v42 }
  0xd2   :  { %v1678_v46 = vpop.eup %1375 }
  0xd3   :  { %v211_v44 = vpop.f32.mrf.mxu0  ;;  %v226_v58 = vpop.f32.mrf.mxu1 }
  0xd4   :  { %1377 = vtanh.f32 %v211_v44 }
  0xd5   :  { %1379 = vtanh.f32 %v214_v43 }
  0xd6   :  { %1381 = vtanh.f32 %v216_v45 }
  0xd7   :  { %1383 = vtanh.f32 %v219_v49 }
  0xd8   :  { %1385 = vtanh.f32 %v221_v52 }
  0xd9   :  { %1387 = vtanh.f32 %v224_v54 }
  0xda   :  { %v1680_v47 = vpop.eup %1377  ;;  %1389 = vtanh.f32 %v226_v58 }
  0xdb   :  { %v257_v48 = vpack.c.bf16 %v1680_v47, %v1678_v46  ;;  %v1684_v50 = vpop.eup %1379  ;;  %1391 = vtanh.f32 %v229_v59 }
  0xdc   :  { %v1686_v51 = vpop.eup %1381  ;;  %1393 = vtanh.f32 %v231_v62 }
  0xdd   :  { %409 = vmatmul.bf16.gmra.mxu1 %v257_v48  ;;  %458 = vmatmul.bf16.gmra.mxu2 %v257_v48  ;;  %v258_v53 = vpack.c.bf16 %v1686_v51, %v1684_v50  ;;  %v1690_v55 = vpop.eup %1383  ;;  %1395 = vtanh.f32 %v234_v0 }
  0xde   :  { %v1692_v56 = vpop.eup %1385  ;;  %1397 = vtanh.f32 %v236_v4 }
  0xdf   :  { %v259_v57 = vpack.c.bf16 %v1692_v56, %v1690_v55  ;;  %v1696_v60 = vpop.eup %1387 }
  0xe0   :  { %v1698_v61 = vpop.eup %1389 }
  0xe1   :  { %v260_v63 = vpack.c.bf16 %v1698_v61, %v1696_v60  ;;  %v1702_v1 = vpop.eup %1391 }
  0xe2   :  { %v1704_v2 = vpop.eup %1393 }
  0xe3   :  { %v261_v3 = vpack.c.bf16 %v1704_v2, %v1702_v1  ;;  %v1708_v5 = vpop.eup %1395 }
  0xe4   :  { %v1710_v6 = vpop.eup %1397 }
  0xe5   :  { %v262_v7 = vpack.c.bf16 %v1710_v6, %v1708_v5 }
  0xed   :  { %414 = vmatmul.bf16.gmra.mxu1 %v258_v53  ;;  %463 = vmatmul.bf16.gmra.mxu2 %v258_v53 }
  0xfd   :  { %419 = vmatmul.bf16.gmra.mxu1 %v259_v57  ;;  %468 = vmatmul.bf16.gmra.mxu2 %v259_v57 }
 0x10d   :  { %424 = vmatmul.bf16.gmra.mxu1 %v260_v63  ;;  %473 = vmatmul.bf16.gmra.mxu2 %v260_v63 }
 0x11d   :  { %429 = vmatmul.bf16.gmra.mxu1 %v261_v3  ;;  %478 = vmatmul.bf16.gmra.mxu2 %v261_v3 }
 0x12d   :  { %434 = vmatmul.bf16.gmra.mxu1 %v262_v7  ;;  %483 = vmatmul.bf16.gmra.mxu2 %v262_v7 }
 0x13a   :  { %v1714_v8 = vpop.f32.mrf.mxu1 }
 0x140   :  { %v1716_v9 = vpop.f32.mrf.mxu2 }
 0x141   :  { %v489_v10 = vmax.f32 %v1714_v8, %v1716_v9 }
 0x142   :  { %v1720_v11 = vpop.f32.mrf.mxu1 }
 0x143   :  { %490 = vmax.xlane.f32.xlu0 %v489_v10 }
 0x148   :  { %v1722_v12 = vpop.f32.mrf.mxu2 }
 0x149   :  { %v492_v13 = vmax.f32 %v1720_v11, %v1722_v12 }
 0x14a   :  { %v1726_v14 = vpop.f32.mrf.mxu1 }
 0x14b   :  { %493 = vmax.xlane.f32.xlu0 %v492_v13 }
 0x150   :  { %v1728_v15 = vpop.f32.mrf.mxu2 }
 0x151   :  { %v495_v16 = vmax.f32 %v1726_v14, %v1728_v15 }
 0x152   :  { %v1732_v17 = vpop.f32.mrf.mxu1 }
 0x153   :  { %496 = vmax.xlane.f32.xlu1 %v495_v16 }
 0x158   :  { %v1734_v18 = vpop.f32.mrf.mxu2 }
 0x159   :  { %v498_v19 = vmax.f32 %v1732_v17, %v1734_v18 }
 0x15a   :  { %v1738_v20 = vpop.f32.mrf.mxu1 }
 0x15b   :  { %499 = vmax.xlane.f32.xlu1 %v498_v19 }
 0x160   :  { %v1740_v21 = vpop.f32.mrf.mxu2 }
 0x161   :  { %v501_v22 = vmax.f32 %v1738_v20, %v1740_v21 }
 0x162   :  { %v1744_v23 = vpop.f32.mrf.mxu1 }
 0x163   :  { %502 = vmax.xlane.f32.xlu2 %v501_v22 }
 0x168   :  { %v1746_v24 = vpop.f32.mrf.mxu2 }
 0x169   :  { %v504_v25 = vmax.f32 %v1744_v23, %v1746_v24 }
 0x16a   :  { %v1750_v26 = vpop.f32.mrf.mxu1 }
 0x16b   :  { %505 = vmax.xlane.f32.xlu2 %v504_v25 }
 0x170   :  { %v1752_v27 = vpop.f32.mrf.mxu2 }
 0x171   :  { %v507_v28 = vmax.f32 %v1750_v26, %v1752_v27 }
 0x172   :  { %v1756_v29 = vpop.f32.mrf.mxu1 }
 0x173   :  { %508 = vmax.xlane.f32.xlu0 %v507_v28 }
 0x178   :  { %v1758_v30 = vpop.f32.mrf.mxu2 }
 0x179   :  { %v510_v31 = vmax.f32 %v1756_v29, %v1758_v30 }
 0x17a   :  { %v1762_v32 = vpop.f32.mrf.mxu1 }
 0x17b   :  { %511 = vmax.xlane.f32.xlu1 %v510_v31 }
 0x180   :  { %v1764_v33 = vpop.f32.mrf.mxu2 }
 0x181   :  { %v513_v36 = vmax.f32 %v1762_v32, %v1764_v33 }
 0x182   :  { %v1768_v37 = vpop.f32.mrf.mxu1 }
 0x183   :  { %514 = vmax.xlane.f32.xlu2 %v513_v36 }
 0x188   :  { %v1770_v38 = vpop.f32.mrf.mxu2 }
 0x189   :  { %v516_v41 = vmax.f32 %v1768_v37, %v1770_v38 }
 0x18a   :  { %v1774_v42 = vpop.f32.mrf.mxu1 }
 0x18b   :  { %517 = vmax.xlane.f32.xlu0 %v516_v41 }
 0x190   :  { %v1776_v43 = vpop.f32.mrf.mxu2 }
 0x191   :  { %v519_v44 = vmax.f32 %v1774_v42, %v1776_v43 }
 0x192   :  { %v1780_v45 = vpop.f32.mrf.mxu1 }
 0x193   :  { %520 = vmax.xlane.f32.xlu1 %v519_v44 }
 0x198   :  { %v1782_v48 = vpop.f32.mrf.mxu2 }
 0x199   :  { %v522_v49 = vmax.f32 %v1780_v45, %v1782_v48 }
 0x19a   :  { %v1786_v52 = vpop.f32.mrf.mxu1 }
 0x19b   :  { %523 = vmax.xlane.f32.xlu2 %v522_v49 }
 0x1a0   :  { %v1788_v53 = vpop.f32.mrf.mxu2 }
 0x1a1   :  { %v525_v54 = vmax.f32 %v1786_v52, %v1788_v53 }
 0x1a2   :  { %v1792_v57 = vpop.f32.mrf.mxu1 }
 0x1a3   :  { %526 = vmax.xlane.f32.xlu0 %v525_v54 }
 0x1a8   :  { %v1794_v58 = vpop.f32.mrf.mxu2 }
 0x1a9   :  { %v528_v59 = vmax.f32 %v1792_v57, %v1794_v58 }
 0x1aa   :  { %v1798_v62 = vpop.f32.mrf.mxu1 }
 0x1ab   :  { %529 = vmax.xlane.f32.xlu1 %v528_v59 }
 0x1b0   :  { %v1800_v63 = vpop.f32.mrf.mxu2 }
 0x1b1   :  { %v531_v0 = vmax.f32 %v1798_v62, %v1800_v63 }
 0x1b2   :  { %v1810_v10 = vpop.f32.mrf.mxu1 }
 0x1b3   :  { %532 = vmax.xlane.f32.xlu2 %v531_v0 }
 0x1b6   :  { %v1804_v3 = vpop.xlane.xlu0 %490 }
 0x1b7   :  { %v585_v4 = vsub.f32 %v1714_v8, %v1804_v3  ;;  %v586_v7 = vsub.f32 %v1716_v9, %v1804_v3 }
 0x1b8   :  { %v1812_v13 = vpop.f32.mrf.mxu2 }
 0x1b9   :  { %v617_v16 = vmul.f32 1.442695, %v585_v4  ;;  %v619_v19 = vmul.f32 1.442695, %v586_v7  ;;  %v534_v22 = vmax.f32 %v1810_v10, %v1812_v13 }
 0x1bb   :  { %1399 = vpow2.f32 %v617_v16  ;;  %535 = vmax.xlane.f32.xlu0 %v534_v22 }
 0x1bc   :  { %1401 = vpow2.f32 %v619_v19 }
 0x1be   :  { %v1816_v25 = vpop.xlane.xlu0 %493 }
 0x1bf   :  { %v587_v8 = vsub.f32 %v1720_v11, %v1816_v25  ;;  %v588_v9 = vsub.f32 %v1722_v12, %v1816_v25 }
 0x1c1   :  { %v1400_v28 = vpop.eup %1399  ;;  %v621_v31 = vmul.f32 1.442695, %v587_v8  ;;  %v623_v36 = vmul.f32 1.442695, %v588_v9 }
 0x1c2   :  { %v1402_v41 = vpop.eup %1401 }
 0x1c3   :  { %1403 = vpow2.f32 %v621_v31  ;;  %v697_v44 = vadd.f32 %v1402_v41, %v1400_v28 }
 0x1c4   :  { %1405 = vpow2.f32 %v623_v36 }
 0x1c5   :  { %698 = vadd.xlane.f32.xlu1 %v697_v44 }
 0x1c6   :  { %v1822_v49 = vpop.xlane.xlu1 %496 }
 0x1c7   :  { %v589_v54 = vsub.f32 %v1726_v14, %v1822_v49  ;;  %v590_v59 = vsub.f32 %v1728_v15, %v1822_v49 }
 0x1c9   :  { %v1404_v11 = vpop.eup %1403  ;;  %v625_v0 = vmul.f32 1.442695, %v589_v54  ;;  %v627_v4 = vmul.f32 1.442695, %v590_v59 }
 0x1ca   :  { %v1406_v12 = vpop.eup %1405  ;;  %v761_v7 = vpack.c.bf16 %v1404_v11, %v1400_v28 }
 0x1cb   :  { %1407 = vpow2.f32 %v625_v0  ;;  %v762_v16 = vpack.c.bf16 %v1406_v12, %v1402_v41  ;;  %v700_v19 = vadd.f32 %v1406_v12, %v1404_v11 }
 0x1cc   :  { %1409 = vpow2.f32 %v627_v4  ;;  %785 = vmatmul.bf16.vlgmr.msrb.gmra.mxu3 %v761_v7 }
 0x1cd   :  { %834 = vmatmul.bf16.vlgmr.msrb.gmra.mxu0 %v762_v16  ;;  %701 = vadd.xlane.f32.xlu2 %v700_v19 }
 0x1ce   :  { %v1828_v22 = vpop.xlane.xlu1 %499 }
 0x1cf   :  { %v591_v14 = vsub.f32 %v1732_v17, %v1828_v22  ;;  %v592_v15 = vsub.f32 %v1734_v18, %v1828_v22 }
 0x1d1   :  { %v1408_v8 = vpop.eup %1407  ;;  %v629_v9 = vmul.f32 1.442695, %v591_v14  ;;  %v631_v31 = vmul.f32 1.442695, %v592_v15 }
 0x1d2   :  { %v1410_v36 = vpop.eup %1409 }
 0x1d3   :  { %1411 = vpow2.f32 %v629_v9  ;;  %v703_v28 = vadd.f32 %v1410_v36, %v1408_v8 }
 0x1d4   :  { %1413 = vpow2.f32 %v631_v31 }
 0x1d5   :  { %704 = vadd.xlane.f32.xlu0 %v703_v28 }
 0x1d6   :  { %v1834_v41 = vpop.xlane.xlu2 %502 }
 0x1d7   :  { %v593_v44 = vsub.f32 %v1738_v20, %v1834_v41  ;;  %v594_v54 = vsub.f32 %v1740_v21, %v1834_v41 }
 0x1d9   :  { %v1412_v17 = vpop.eup %1411  ;;  %v633_v59 = vmul.f32 1.442695, %v593_v44  ;;  %v635_v11 = vmul.f32 1.442695, %v594_v54 }
 0x1da   :  { %v1414_v18 = vpop.eup %1413  ;;  %v763_v0 = vpack.c.bf16 %v1412_v17, %v1408_v8 }
 0x1db   :  { %1415 = vpow2.f32 %v633_v59  ;;  %v764_v4 = vpack.c.bf16 %v1414_v18, %v1410_v36  ;;  %v706_v12 = vadd.f32 %v1414_v18, %v1412_v17 }
 0x1dc   :  { %1417 = vpow2.f32 %v635_v11  ;;  %790 = vmatmul.bf16.gmra.mxu3 %v763_v0 }
 0x1dd   :  { %839 = vmatmul.bf16.gmra.mxu0 %v764_v4  ;;  %707 = vadd.xlane.f32.xlu1 %v706_v12 }
 0x1de   :  { %v1840_v7 = vpop.xlane.xlu2 %505 }
 0x1df   :  { %v595_v20 = vsub.f32 %v1744_v23, %v1840_v7  ;;  %v596_v21 = vsub.f32 %v1746_v24, %v1840_v7 }
 0x1e1   :  { %v1416_v16 = vpop.eup %1415  ;;  %v637_v19 = vmul.f32 1.442695, %v595_v20  ;;  %v639_v14 = vmul.f32 1.442695, %v596_v21 }
 0x1e2   :  { %v1418_v15 = vpop.eup %1417 }
 0x1e3   :  { %1419 = vpow2.f32 %v637_v19  ;;  %v709_v8 = vadd.f32 %v1418_v15, %v1416_v16 }
 0x1e4   :  { %1421 = vpow2.f32 %v639_v14 }
 0x1e5   :  { %710 = vadd.xlane.f32.xlu2 %v709_v8 }
 0x1e6   :  { %v1846_v9 = vpop.xlane.xlu0 %508 }
 0x1e7   :  { %v597_v31 = vsub.f32 %v1750_v26, %v1846_v9  ;;  %v598_v36 = vsub.f32 %v1752_v27, %v1846_v9 }
 0x1e9   :  { %v1420_v23 = vpop.eup %1419  ;;  %v641_v28 = vmul.f32 1.442695, %v597_v31  ;;  %v643_v44 = vmul.f32 1.442695, %v598_v36 }
 0x1ea   :  { %v1422_v24 = vpop.eup %1421  ;;  %v765_v54 = vpack.c.bf16 %v1420_v23, %v1416_v16 }
 0x1eb   :  { %1423 = vpow2.f32 %v641_v28  ;;  %v766_v17 = vpack.c.bf16 %v1422_v24, %v1418_v15  ;;  %v712_v59 = vadd.f32 %v1422_v24, %v1420_v23 }
 0x1ec   :  { %1425 = vpow2.f32 %v643_v44  ;;  %795 = vmatmul.bf16.gmra.mxu3 %v765_v54 }
 0x1ed   :  { %844 = vmatmul.bf16.gmra.mxu0 %v766_v17  ;;  %713 = vadd.xlane.f32.xlu0 %v712_v59 }
 0x1ee   :  { %v1852_v11 = vpop.xlane.xlu1 %511 }
 0x1ef   :  { %v599_v26 = vsub.f32 %v1756_v29, %v1852_v11  ;;  %v600_v27 = vsub.f32 %v1758_v30, %v1852_v11 }
 0x1f1   :  { %v1424_v18 = vpop.eup %1423  ;;  %v645_v0 = vmul.f32 1.442695, %v599_v26  ;;  %v647_v4 = vmul.f32 1.442695, %v600_v27 }
 0x1f2   :  { %v1426_v12 = vpop.eup %1425 }
 0x1f3   :  { %1427 = vpow2.f32 %v645_v0  ;;  %v715_v20 = vadd.f32 %v1426_v12, %v1424_v18 }
 0x1f4   :  { %1429 = vpow2.f32 %v647_v4 }
 0x1f5   :  { %716 = vadd.xlane.f32.xlu1 %v715_v20 }
 0x1f6   :  { %v1858_v21 = vpop.xlane.xlu2 %514 }
 0x1f7   :  { %v601_v16 = vsub.f32 %v1762_v32, %v1858_v21  ;;  %v602_v19 = vsub.f32 %v1764_v33, %v1858_v21 }
 0x1f9   :  { %v1428_v29 = vpop.eup %1427  ;;  %v649_v14 = vmul.f32 1.442695, %v601_v16  ;;  %v651_v15 = vmul.f32 1.442695, %v602_v19 }
 0x1fa   :  { %v1430_v30 = vpop.eup %1429  ;;  %v767_v8 = vpack.c.bf16 %v1428_v29, %v1424_v18 }
 0x1fb   :  { %1431 = vpow2.f32 %v649_v14  ;;  %v768_v31 = vpack.c.bf16 %v1430_v30, %v1426_v12  ;;  %v718_v36 = vadd.f32 %v1430_v30, %v1428_v29 }
 0x1fc   :  { %1433 = vpow2.f32 %v651_v15  ;;  %800 = vmatmul.bf16.gmra.mxu3 %v767_v8 }
 0x1fd   :  { %849 = vmatmul.bf16.gmra.mxu0 %v768_v31  ;;  %719 = vadd.xlane.f32.xlu2 %v718_v36 }
 0x1fe   :  { %v1864_v23 = vpop.xlane.xlu0 %517 }
 0x1ff   :  { %v603_v32 = vsub.f32 %v1768_v37, %v1864_v23  ;;  %v604_v33 = vsub.f32 %v1770_v38, %v1864_v23 }
 0x201   :  { %v1432_v28 = vpop.eup %1431  ;;  %v653_v44 = vmul.f32 1.442695, %v603_v32  ;;  %v655_v24 = vmul.f32 1.442695, %v604_v33 }
 0x202   :  { %v1434_v54 = vpop.eup %1433 }
 0x203   :  { %1435 = vpow2.f32 %v653_v44  ;;  %v721_v17 = vadd.f32 %v1434_v54, %v1432_v28 }
 0x204   :  { %1437 = vpow2.f32 %v655_v24 }
 0x205   :  { %722 = vadd.xlane.f32.xlu0 %v721_v17 }
 0x206   :  { %v1870_v59 = vpop.xlane.xlu1 %520 }
 0x207   :  { %v605_v26 = vsub.f32 %v1774_v42, %v1870_v59  ;;  %v606_v27 = vsub.f32 %v1776_v43, %v1870_v59 }
 0x209   :  { %v1436_v37 = vpop.eup %1435  ;;  %v657_v18 = vmul.f32 1.442695, %v605_v26  ;;  %v659_v0 = vmul.f32 1.442695, %v606_v27 }
 0x20a   :  { %v1438_v38 = vpop.eup %1437  ;;  %v769_v4 = vpack.c.bf16 %v1436_v37, %v1432_v28 }
 0x20b   :  { %1439 = vpow2.f32 %v657_v18  ;;  %v770_v12 = vpack.c.bf16 %v1438_v38, %v1434_v54  ;;  %v724_v20 = vadd.f32 %v1438_v38, %v1436_v37 }
 0x20c   :  { %1441 = vpow2.f32 %v659_v0  ;;  %805 = vmatmul.bf16.gmra.mxu3 %v769_v4  ;;  %v537_v0 = vsub.f32 -inf, %v1804_v3  ;;  %v538_v3 = vsub.f32 -inf, %v1816_v25  ;;  %v539_v25 = vsub.f32 -inf, %v1822_v49 }
 0x20d   :  { %854 = vmatmul.bf16.gmra.mxu0 %v770_v12  ;;  %725 = vadd.xlane.f32.xlu1 %v724_v20 }
 0x20e   :  { %v1876_v16 = vpop.xlane.xlu2 %523 }
 0x20f   :  { %v607_v42 = vsub.f32 %v1780_v45, %v1876_v16  ;;  %v608_v43 = vsub.f32 %v1782_v48, %v1876_v16 }
 0x211   :  { %v1440_v19 = vpop.eup %1439  ;;  %v661_v29 = vmul.f32 1.442695, %v607_v42  ;;  %v663_v14 = vmul.f32 1.442695, %v608_v43  ;;  %v553_v43 = vmul.f32 1.442695, %v537_v0 }
 0x212   :  { %v1442_v15 = vpop.eup %1441 }
 0x213   :  { %1443 = vpow2.f32 %v661_v29  ;;  %v727_v30 = vadd.f32 %v1442_v15, %v1440_v19 }
 0x214   :  { %1445 = vpow2.f32 %v663_v14 }
 0x215   :  { %728 = vadd.xlane.f32.xlu2 %v727_v30 }
 0x216   :  { %v1882_v8 = vpop.xlane.xlu0 %526 }
 0x217   :  { %v609_v31 = vsub.f32 %v1786_v52, %v1882_v8  ;;  %v610_v36 = vsub.f32 %v1788_v53, %v1882_v8 }
 0x219   :  { %v1444_v45 = vpop.eup %1443  ;;  %v665_v32 = vmul.f32 1.442695, %v609_v31  ;;  %v667_v33 = vmul.f32 1.442695, %v610_v36 }
 0x21a   :  { %v1446_v48 = vpop.eup %1445  ;;  %v771_v28 = vpack.c.bf16 %v1444_v45, %v1440_v19 }
 0x21b   :  { %1447 = vpow2.f32 %v665_v32  ;;  %v772_v44 = vpack.c.bf16 %v1446_v48, %v1442_v15  ;;  %v730_v24 = vadd.f32 %v1446_v48, %v1444_v45  ;;  %v555_v32 = vmul.f32 1.442695, %v538_v3 }
 0x21c   :  { %1449 = vpow2.f32 %v667_v33  ;;  %810 = vmatmul.bf16.gmra.mxu3 %v771_v28 }
 0x21d   :  { %859 = vmatmul.bf16.gmra.mxu0 %v772_v44  ;;  %731 = vadd.xlane.f32.xlu0 %v730_v24 }
 0x21e   :  { %v1888_v54 = vpop.xlane.xlu1 %529 }
 0x21f   :  { %v611_v52 = vsub.f32 %v1792_v57, %v1888_v54  ;;  %v612_v53 = vsub.f32 %v1794_v58, %v1888_v54 }
 0x221   :  { %v1448_v17 = vpop.eup %1447  ;;  %v669_v26 = vmul.f32 1.442695, %v611_v52  ;;  %v671_v27 = vmul.f32 1.442695, %v612_v53  ;;  %v557_v53 = vmul.f32 1.442695, %v539_v25 }
 0x222   :  { %v1450_v37 = vpop.eup %1449 }
 0x223   :  { %1451 = vpow2.f32 %v669_v26  ;;  %v733_v18 = vadd.f32 %v1450_v37, %v1448_v17 }
 0x224   :  { %1453 = vpow2.f32 %v671_v27 }
 0x225   :  { %734 = vadd.xlane.f32.xlu1 %v733_v18 }
 0x226   :  { %v1895_v38 = vpop.xlane.xlu2 %532 }
 0x227   :  { %v613_v4 = vsub.f32 %v1798_v62, %v1895_v38  ;;  %v614_v57 = vsub.f32 %v1800_v63, %v1895_v38 }
 0x229   :  { %v1452_v12 = vpop.eup %1451  ;;  %v673_v58 = vmul.f32 1.442695, %v613_v4  ;;  %v675_v20 = vmul.f32 1.442695, %v614_v57 }
 0x22a   :  { %v1454_v42 = vpop.eup %1453  ;;  %v773_v19 = vpack.c.bf16 %v1452_v12, %v1448_v17 }
 0x22b   :  { %1455 = vpow2.f32 %v673_v58  ;;  %v774_v29 = vpack.c.bf16 %v1454_v42, %v1450_v37  ;;  %v736_v14 = vadd.f32 %v1454_v42, %v1452_v12  ;;  %v540_v37 = vsub.f32 -inf, %v1828_v22 }
 0x22c   :  { %1457 = vpow2.f32 %v675_v20  ;;  %815 = vmatmul.bf16.gmra.mxu3 %v773_v19  ;;  %v541_v42 = vsub.f32 -inf, %v1834_v41 }
 0x22d   :  { %864 = vmatmul.bf16.gmra.mxu0 %v774_v29  ;;  %737 = vadd.xlane.f32.xlu2 %v736_v14  ;;  %1459 = vpow2.f32 %v553_v43  ;;  %v559_v57 = vmul.f32 1.442695, %v540_v37 }
 0x22e   :  { %v1902_v15 = vpop.xlane.xlu0 %535  ;;  %v561_v3 = vmul.f32 1.442695, %v541_v42 }
 0x22f   :  { %v615_v62 = vsub.f32 %v1810_v10, %v1902_v15  ;;  %v616_v63 = vsub.f32 %v1812_v13, %v1902_v15 }
 0x231   :  { %v1456_v30 = vpop.eup %1455  ;;  %v677_v31 = vmul.f32 1.442695, %v615_v62  ;;  %v679_v36 = vmul.f32 1.442695, %v616_v63 }
 0x232   :  { %v1458_v45 = vpop.eup %1457 }
 0x233   :  { %1461 = vpow2.f32 %v677_v31  ;;  %v739_v33 = vadd.f32 %v1458_v45, %v1456_v30  ;;  %v1460_v48 = vpop.eup %1459 }
 0x234   :  { %1463 = vpow2.f32 %v679_v36  ;;  %v681_v28 = vmul.f32 0.0, %v1460_v48 }
 0x235   :  { %740 = vadd.xlane.f32.xlu0 %v739_v33  ;;  %1465 = vpow2.f32 %v555_v32 }
 0x238   :  { %v699_v44 = vpop.xlane.xlu1 %698 }
 0x239   :  { %v1462_v24 = vpop.eup %1461  ;;  %v745_v10 = vadd.f32 %v699_v44, %v681_v28 }
 0x23a   :  { %v1464_v52 = vpop.eup %1463  ;;  %v775_v13 = vpack.c.bf16 %v1462_v24, %v1456_v30 }
 0x23b   :  { %1467 = vrcp.f32 %v745_v10  ;;  %v776_v17 = vpack.c.bf16 %v1464_v52, %v1458_v45  ;;  %v742_v26 = vadd.f32 %v1464_v52, %v1462_v24  ;;  %v1466_v27 = vpop.eup %1465  ;;  %v902_v41 = vand.u32 2147483648, %v745_v10 }
 0x23c   :  { %820 = vmatmul.bf16.gmra.mxu3 %v775_v13  ;;  %1469 = vpow2.f32 %v557_v53  ;;  %v1910_v18 = vmul.f32 0.0, %v1466_v27  ;;  %v542_v45 = vsub.f32 -inf, %v1840_v7  ;;  %vm896_vm1 = vweird.f32 %v745_v10 }
 0x23d   :  { %869 = vmatmul.bf16.gmra.mxu0 %v776_v17  ;;  %743 = vadd.xlane.f32.xlu1 %v742_v26  ;;  %v900_v32 = vand.u32 2147483647, %v745_v10  ;;  %v903_v13 = vor.u32 1.1754944e-38, %v902_v41 }
 0x23e   :  { %v563_v26 = vmul.f32 1.442695, %v542_v45 }
 0x23f   :  { %vm901_vm3 = vcmp.eq.f32.partialorder %v900_v32, 8.507059e+37 }
 0x240   :  { %v702_v49 = vpop.xlane.xlu2 %701 }
 0x241   :  { %v1468_v0 = vpop.eup %1467  ;;  %v1913_v4 = vadd.f32 %v702_v49, %v1910_v18 }
 0x242   :  { %v892_v12 = vmul.f32 %v1468_v0, %v745_v10  ;;  %v1470_v58 = vpop.eup %1469  ;;  %vm897_vm0 = vweird.f32 %v1468_v0 }
 0x243   :  { %1471 = vrcp.f32 %v1913_v4  ;;  %v1917_v43 = vmul.f32 0.0, %v1470_v58  ;;  %vm898_vm2 = vmor %vm896_vm1, %vm897_vm0  ;;  %v543_v58 = vsub.f32 -inf, %v1846_v9  ;;  %vm911_vm5 = vweird.f32 %v1913_v4 }
 0x244   :  { %v893_v20 = vsub.f32 1.0, %v892_v12  ;;  %1473 = vpow2.f32 %v559_v57 }
 0x246   :  { %v894_v19 = vmul.f32 %v1468_v0, %v893_v20  ;;  %v917_v20 = vand.u32 2147483648, %v1913_v4 }
 0x248   :  { %v705_v22 = vpop.xlane.xlu0 %704  ;;  %v895_v36 = vadd.f32 %v1468_v0, %v894_v19 }
 0x249   :  { %v1472_v29 = vpop.eup %1471  ;;  %v1920_v14 = vadd.f32 %v705_v22, %v1917_v43 }
 0x24a   :  { %v907_v62 = vmul.f32 %v1472_v29, %v1913_v4  ;;  %v835_v63 = vpop.f32.mrf.mxu0  ;;  %v1474_v30 = vpop.eup %1473  ;;  %v899_v44 = vsel %vm898_vm2, %v1468_v0, %v895_v36  ;;  %vm912_vm4 = vweird.f32 %v1472_v29 }
 0x24b   :  { %1475 = vrcp.f32 %v1920_v14  ;;  %v1925_v48 = vmul.f32 0.0, %v1474_v30  ;;  %v904_v37 = vsel %vm901_vm3, %v903_v13, %v899_v44  ;;  %vm1940_vm6 = vmor %vm911_vm5, %vm912_vm4  ;;  %v544_v13 = vsub.f32 -inf, %v1852_v11 }
 0x24c   :  { %v908_v31 = vsub.f32 1.0, %v907_v62  ;;  %1477 = vpow2.f32 %v561_v3  ;;  %vm926_vm9 = vweird.f32 %v1920_v14 }
 0x24e   :  { %v909_v52 = vmul.f32 %v1472_v29, %v908_v31  ;;  %v565_v31 = vmul.f32 1.442695, %v543_v58 }
 0x24f   :  { %v786_v33 = vpop.f32.mrf.mxu3 }
 0x250   :  { %v836_v25 = vadd.f32 %v835_v63, %v786_v33  ;;  %v708_v24 = vpop.xlane.xlu1 %707  ;;  %v910_v12 = vadd.f32 %v1472_v29, %v909_v52  ;;  %v932_v52 = vand.u32 2147483648, %v1920_v14 }
 0x251   :  { %v1927_v53 = vpop.eup %1475  ;;  %v1930_v17 = vadd.f32 %v708_v24, %v1925_v48 }
 0x252   :  { %v922_v7 = vmul.f32 %v1927_v53, %v1920_v14  ;;  %v875_v10 = vadd.f32 %v836_v25, %v681_v28  ;;  %v837_v27 = vpop.f32.mrf.mxu0  ;;  %v1478_v49 = vpop.eup %1477  ;;  %v915_v28 = vand.u32 2147483647, %v1913_v4  ;;  %v914_v9 = vsel %vm1940_vm6, %v1472_v29, %v910_v12 }
 0x253   :  { %1479 = vrcp.f32 %v1930_v17  ;;  %v1944_v3 = vmul.f32 0.0, %v1478_v49  ;;  %v918_v4 = vor.u32 1.1754944e-38, %v917_v20  ;;  %vm927_vm8 = vweird.f32 %v1927_v53 }
 0x254   :  { %v923_v0 = vsub.f32 1.0, %v922_v7  ;;  %v905_v57 = vmul.f32 %v904_v37, %v875_v10  ;;  %1481 = vpow2.f32 %v563_v26  ;;  %vm916_vm7 = vcmp.eq.f32.partialorder %v915_v28, 8.507059e+37  ;;  %vm1965_vm10 = vmor %vm926_vm9, %vm927_vm8 }
 0x255   :  { %v919_v33 = vsel %vm916_vm7, %v918_v4, %v914_v9  ;;  %v567_v12 = vmul.f32 1.442695, %v544_v13  ;;  %v545_v9 = vsub.f32 -inf, %v1858_v21  ;;  %vm941_vm13 = vweird.f32 %v1930_v17 }
 0x256   :  { %v1131_v42 = vadd.f32 %v1666_v34, %v905_v57  ;;  %v924_v34 = vmul.f32 %v1927_v53, %v923_v0  ;;  %v933_v57 = vor.u32 1.1754944e-38, %v932_v52 }
 0x257   :  { %v788_v22 = vpop.f32.mrf.mxu3 }
 0x258   :  { %1147 = vst [vmem:[#allocation8] sm:$0xff] %v1131_v42  ;;  %v838_v62 = vadd.f32 %v837_v27, %v788_v22  ;;  %v711_v63 = vpop.xlane.xlu2 %710  ;;  %v925_v24 = vadd.f32 %v1927_v53, %v924_v34 }
 0x259   :  { %v1949_v30 = vpop.eup %1479  ;;  %v1952_v36 = vadd.f32 %v711_v63, %v1944_v3  ;;  %v947_v63 = vand.u32 2147483648, %v1930_v17 }
 0x25a   :  { %v937_v41 = vmul.f32 %v1949_v30, %v1930_v17  ;;  %v876_v45 = vadd.f32 %v838_v62, %v1910_v18  ;;  %v840_v32 = vpop.f32.mrf.mxu0  ;;  %v1482_v29 = vpop.eup %1481  ;;  %v930_v18 = vand.u32 2147483647, %v1920_v14  ;;  %v929_v49 = vsel %vm1965_vm10, %v1927_v53, %v925_v24 }
 0x25b   :  { %1483 = vrcp.f32 %v1952_v36  ;;  %v1969_v27 = vmul.f32 0.0, %v1482_v29  ;;  %vm942_vm12 = vweird.f32 %v1949_v30  ;;  %v948_v29 = vor.u32 1.1754944e-38, %v947_v63 }
 0x25c   :  { %v938_v25 = vsub.f32 1.0, %v937_v41  ;;  %v920_v44 = vmul.f32 %v919_v33, %v876_v45  ;;  %1485 = vpow2.f32 %v565_v31  ;;  %vm931_vm11 = vcmp.eq.f32.partialorder %v930_v18, 8.507059e+37  ;;  %vm1991_vm14 = vmor %vm941_vm13, %vm942_vm12 }
 0x25d   :  { %v934_v22 = vsel %vm931_vm11, %v933_v57, %v929_v49  ;;  %v962_v10 = vand.u32 2147483648, %v1952_v36  ;;  %vm956_vm1 = vweird.f32 %v1952_v36 }
 0x25e   :  { %v1132_v26 = vadd.f32 %v1668_v35, %v920_v44  ;;  %v939_v35 = vmul.f32 %v1949_v30, %v938_v25 }
 0x25f   :  { %v791_v7 = vpop.f32.mrf.mxu3 }
 0x260   :  { %1148 = vst [vmem:[#allocation8 + $0x8] sm:$0xff] %v1132_v26  ;;  %v841_v37 = vadd.f32 %v840_v32, %v791_v7  ;;  %v714_v11 = vpop.xlane.xlu0 %713  ;;  %v940_v62 = vadd.f32 %v1949_v30, %v939_v35 }
 0x261   :  { %v1975_v0 = vpop.eup %1483  ;;  %v1978_v14 = vadd.f32 %v714_v11, %v1969_v27 }
 0x262   :  { %v952_v58 = vmul.f32 %v1975_v0, %v1952_v36  ;;  %v877_v20 = vadd.f32 %v841_v37, %v1917_v43  ;;  %v842_v42 = vpop.f32.mrf.mxu0  ;;  %v1486_v28 = vpop.eup %1485  ;;  %v945_v43 = vand.u32 2147483647, %v1930_v17  ;;  %v944_v21 = vsel %vm1991_vm14, %v1949_v30, %v940_v62 }
 0x263   :  { %1487 = vrcp.f32 %v1978_v14  ;;  %v1995_v41 = vmul.f32 0.0, %v1486_v28  ;;  %v569_v17 = vmul.f32 1.442695, %v545_v9  ;;  %vm957_vm0 = vweird.f32 %v1975_v0 }
 0x264   :  { %v953_v53 = vsub.f32 1.0, %v952_v58  ;;  %v935_v19 = vmul.f32 %v934_v22, %v877_v20  ;;  %1489 = vpow2.f32 %v567_v12  ;;  %vm946_vm15 = vcmp.eq.f32.partialorder %v945_v43, 8.507059e+37  ;;  %vm2017_vm2 = vmor %vm956_vm1, %vm957_vm0 }
 0x265   :  { %v949_v13 = vsel %vm946_vm15, %v948_v29, %v944_v21  ;;  %v546_v37 = vsub.f32 -inf, %v1864_v23  ;;  %v547_v43 = vsub.f32 -inf, %v1870_v59  ;;  %vm971_vm5 = vweird.f32 %v1978_v14 }
 0x266   :  { %v1133_v34 = vadd.f32 %v1672_v39, %v935_v19  ;;  %v954_v39 = vmul.f32 %v1975_v0, %v953_v53 }
 0x267   :  { %v793_v31 = vpop.f32.mrf.mxu3  ;;  %v571_v28 = vmul.f32 1.442695, %v546_v37 }
 0x268   :  { %1149 = vst [vmem:[#allocation8 + $0x10] sm:$0xff] %v1133_v34  ;;  %v843_v45 = vadd.f32 %v842_v42, %v793_v31  ;;  %v717_v32 = vpop.xlane.xlu1 %716  ;;  %v955_v7 = vadd.f32 %v1975_v0, %v954_v39  ;;  %v963_v42 = vor.u32 1.1754944e-38, %v962_v10  ;;  %v977_v31 = vand.u32 2147483648, %v1978_v14 }
 0x269   :  { %v2001_v33 = vpop.eup %1487  ;;  %v2004_v25 = vadd.f32 %v717_v32, %v1995_v41 }
 0x26a   :  { %v967_v44 = vmul.f32 %v2001_v33, %v1978_v14  ;;  %v878_v24 = vadd.f32 %v843_v45, %v1925_v48  ;;  %v845_v52 = vpop.f32.mrf.mxu0  ;;  %v1490_v30 = vpop.eup %1489  ;;  %v960_v48 = vand.u32 2147483647, %v1952_v36  ;;  %v959_v58 = vsel %vm2017_vm2, %v1975_v0, %v955_v7 }
 0x26b   :  { %1491 = vrcp.f32 %v2004_v25  ;;  %v2021_v57 = vmul.f32 0.0, %v1490_v30  ;;  %vm972_vm4 = vweird.f32 %v2001_v33  ;;  %v992_v37 = vand.u32 2147483648, %v2004_v25 }
 0x26c   :  { %v968_v26 = vsub.f32 1.0, %v967_v44  ;;  %v950_v18 = vmul.f32 %v949_v13, %v878_v24  ;;  %1493 = vpow2.f32 %v569_v17  ;;  %vm961_vm3 = vcmp.eq.f32.partialorder %v960_v48, 8.507059e+37  ;;  %vm2043_vm6 = vmor %vm971_vm5, %vm972_vm4 }
 0x26d   :  { %v964_v9 = vsel %vm961_vm3, %v963_v42, %v959_v58  ;;  %v978_v44 = vor.u32 1.1754944e-38, %v977_v31  ;;  %vm986_vm9 = vweird.f32 %v2004_v25  ;;  %v993_v42 = vor.u32 1.1754944e-38, %v992_v37 }
 0x26e   :  { %v1134_v49 = vadd.f32 %v1674_v40, %v950_v18  ;;  %v969_v40 = vmul.f32 %v2001_v33, %v968_v26 }
 0x26f   :  { %v796_v11 = vpop.f32.mrf.mxu3 }
 0x270   :  { %1150 = vst [vmem:[#allocation8 + $0x18] sm:$0xff] %v1134_v49  ;;  %v846_v12 = vadd.f32 %v845_v52, %v796_v11  ;;  %v720_v23 = vpop.xlane.xlu2 %719  ;;  %v970_v34 = vadd.f32 %v2001_v33, %v969_v40  ;;  %v548_v49 = vsub.f32 -inf, %v1876_v16 }
 0x271   :  { %v2027_v20 = vpop.eup %1491  ;;  %v2030_v36 = vadd.f32 %v720_v23, %v2021_v57 }
 0x272   :  { %v982_v22 = vmul.f32 %v2027_v20, %v2004_v25  ;;  %v879_v53 = vadd.f32 %v846_v12, %v1944_v3  ;;  %v847_v19 = vpop.f32.mrf.mxu0  ;;  %v1494_v62 = vpop.eup %1493  ;;  %v975_v3 = vand.u32 2147483647, %v1978_v14  ;;  %v974_v59 = vsel %vm2043_vm6, %v2001_v33, %v970_v34 }
 0x273   :  { %1495 = vrcp.f32 %v2030_v36  ;;  %v2047_v32 = vmul.f32 0.0, %v1494_v62  ;;  %v573_v14 = vmul.f32 1.442695, %v547_v43  ;;  %vm987_vm8 = vweird.f32 %v2027_v20 }
 0x274   :  { %v983_v0 = vsub.f32 1.0, %v982_v22  ;;  %v965_v63 = vmul.f32 %v964_v9, %v879_v53  ;;  %1497 = vpow2.f32 %v571_v28  ;;  %vm976_vm7 = vcmp.eq.f32.partialorder %v975_v3, 8.507059e+37  ;;  %vm2069_vm10 = vmor %vm986_vm9, %vm987_vm8 }
 0x275   :  { %v979_v26 = vsel %vm976_vm7, %v978_v44, %v974_v59  ;;  %v575_v28 = vmul.f32 1.442695, %v548_v49  ;;  %v549_v34 = vsub.f32 -inf, %v1882_v8  ;;  %v1007_v43 = vand.u32 2147483648, %v2030_v36 }
 0x276   :  { %v1135_v4 = vadd.f32 %v1678_v46, %v965_v63  ;;  %v984_v46 = vmul.f32 %v2027_v20, %v983_v0  ;;  %vm1001_vm13 = vweird.f32 %v2030_v36 }
 0x277   :  { %v798_v45 = vpop.f32.mrf.mxu3 }
 0x278   :  { %1151 = vst [vmem:[#allocation8 + $0x20] sm:$0xff] %v1135_v4  ;;  %v848_v39 = vadd.f32 %v847_v19, %v798_v45  ;;  %v723_v17 = vpop.xlane.xlu0 %722  ;;  %v985_v10 = vadd.f32 %v2027_v20, %v984_v46 }
 0x279   :  { %v2053_v29 = vpop.eup %1495  ;;  %v2056_v24 = vadd.f32 %v723_v17, %v2047_v32  ;;  %v1008_v17 = vor.u32 1.1754944e-38, %v1007_v43 }
 0x27a   :  { %v997_v52 = vmul.f32 %v2053_v29, %v2030_v36  ;;  %v880_v13 = vadd.f32 %v848_v39, %v1969_v27  ;;  %v850_v30 = vpop.f32.mrf.mxu0  ;;  %v1498_v33 = vpop.eup %1497  ;;  %v990_v27 = vand.u32 2147483647, %v2004_v25  ;;  %v989_v23 = vsel %vm2069_vm10, %v2027_v20, %v985_v10 }
 0x27b   :  { %1499 = vrcp.f32 %v2056_v24  ;;  %v2073_v12 = vmul.f32 0.0, %v1498_v33  ;;  %vm1002_vm12 = vweird.f32 %v2053_v29  ;;  %vm1016_vm1 = vweird.f32 %v2056_v24 }
 0x27c   :  { %v998_v18 = vsub.f32 1.0, %v997_v52  ;;  %v980_v7 = vmul.f32 %v979_v26, %v880_v13  ;;  %1501 = vpow2.f32 %v573_v14  ;;  %vm991_vm11 = vcmp.eq.f32.partialorder %v990_v27, 8.507059e+37  ;;  %vm2095_vm14 = vmor %vm1001_vm13, %vm1002_vm12 }
 0x27d   :  { %v994_v9 = vsel %vm991_vm11, %v993_v42, %v989_v23 }
 0x27e   :  { %v1136_v48 = vadd.f32 %v1680_v47, %v980_v7  ;;  %v999_v47 = vmul.f32 %v2053_v29, %v998_v18  ;;  %v1022_v18 = vand.u32 2147483648, %v2056_v24  ;;  %v550_v7 = vsub.f32 -inf, %v1888_v54 }
 0x27f   :  { %v801_v11 = vpop.f32.mrf.mxu3 }
 0x280   :  { %1152 = vst [vmem:[#allocation8 + $0x28] sm:$0xff] %v1136_v48  ;;  %v851_v58 = vadd.f32 %v850_v30, %v801_v11  ;;  %v726_v16 = vpop.xlane.xlu1 %725  ;;  %v1000_v63 = vadd.f32 %v2053_v29, %v999_v47  ;;  %v579_v23 = vmul.f32 1.442695, %v550_v7 }
 0x281   :  { %v2079_v40 = vpop.eup %1499  ;;  %v2082_v25 = vadd.f32 %v726_v16, %v2073_v12 }
 0x282   :  { %v1012_v22 = vmul.f32 %v2079_v40, %v2056_v24  ;;  %v881_v53 = vadd.f32 %v851_v58, %v1995_v41  ;;  %v852_v19 = vpop.f32.mrf.mxu0  ;;  %v1502_v62 = vpop.eup %1501  ;;  %v1005_v41 = vand.u32 2147483647, %v2030_v36  ;;  %v1004_v8 = vsel %vm2095_vm14, %v2053_v29, %v1000_v63 }
 0x283   :  { %1503 = vrcp.f32 %v2082_v25  ;;  %v2099_v45 = vmul.f32 0.0, %v1502_v62  ;;  %v577_v36 = vmul.f32 1.442695, %v549_v34  ;;  %vm1017_vm0 = vweird.f32 %v2079_v40 }
 0x284   :  { %v1013_v20 = vsub.f32 1.0, %v1012_v22  ;;  %v995_v0 = vmul.f32 %v994_v9, %v881_v53  ;;  %1505 = vpow2.f32 %v575_v28  ;;  %vm1006_vm15 = vcmp.eq.f32.partialorder %v1005_v41, 8.507059e+37  ;;  %vm2121_vm2 = vmor %vm1016_vm1, %vm1017_vm0 }
 0x285   :  { %v1009_v13 = vsel %vm1006_vm15, %v1008_v17, %v1004_v8  ;;  %v1023_v58 = vor.u32 1.1754944e-38, %v1022_v18  ;;  %v551_v62 = vsub.f32 -inf, %v1895_v38  ;;  %v1037_v9 = vand.u32 2147483648, %v2082_v25 }
 0x286   :  { %v1137_v31 = vadd.f32 %v1684_v50, %v995_v0  ;;  %v1014_v50 = vmul.f32 %v2079_v40, %v1013_v20  ;;  %vm1031_vm5 = vweird.f32 %v2082_v25 }
 0x287   :  { %v803_v4 = vpop.f32.mrf.mxu3 }
 0x288   :  { %1153 = vst [vmem:[#allocation8 + $0x30] sm:$0xff] %v1137_v31  ;;  %v853_v21 = vadd.f32 %v852_v19, %v803_v4  ;;  %v729_v39 = vpop.xlane.xlu2 %728  ;;  %v1015_v33 = vadd.f32 %v2079_v40, %v1014_v50  ;;  %v1038_v4 = vor.u32 1.1754944e-38, %v1037_v9 }
 0x289   :  { %v2105_v59 = vpop.eup %1503  ;;  %v2108_v46 = vadd.f32 %v729_v39, %v2099_v45 }
 0x28a   :  { %v1027_v14 = vmul.f32 %v2105_v59, %v2082_v25  ;;  %v882_v44 = vadd.f32 %v853_v21, %v2021_v57  ;;  %v855_v52 = vpop.f32.mrf.mxu0  ;;  %v1506_v29 = vpop.eup %1505  ;;  %v1020_v57 = vand.u32 2147483647, %v2056_v24  ;;  %v1019_v11 = vsel %vm2121_vm2, %v2079_v40, %v1015_v33 }
 0x28b   :  { %1507 = vrcp.f32 %v2108_v46  ;;  %v2125_v48 = vmul.f32 0.0, %v1506_v29  ;;  %vm1032_vm4 = vweird.f32 %v2105_v59  ;;  %vm1046_vm9 = vweird.f32 %v2108_v46 }
 0x28c   :  { %v1028_v30 = vsub.f32 1.0, %v1027_v14  ;;  %v1010_v26 = vmul.f32 %v1009_v13, %v882_v44  ;;  %1509 = vpow2.f32 %v577_v36  ;;  %vm1021_vm3 = vcmp.eq.f32.partialorder %v1020_v57, 8.507059e+37  ;;  %vm2147_vm6 = vmor %vm1031_vm5, %vm1032_vm4 }
 0x28d   :  { %v1024_v22 = vsel %vm1021_vm3, %v1023_v58, %v1019_v11  ;;  %v1052_v44 = vand.u32 2147483648, %v2108_v46 }
 0x28e   :  { %v1138_v10 = vadd.f32 %v1686_v51, %v1010_v26  ;;  %v1029_v51 = vmul.f32 %v2105_v59, %v1028_v30 }
 0x28f   :  { %v806_v37 = vpop.f32.mrf.mxu3 }
 0x290   :  { %1154 = vst [vmem:[#allocation8 + $0x38] sm:$0xff] %v1138_v10  ;;  %v856_v27 = vadd.f32 %v855_v52, %v806_v37  ;;  %v732_v54 = vpop.xlane.xlu0 %731  ;;  %v1030_v19 = vadd.f32 %v2105_v59, %v1029_v51  ;;  %v552_v52 = vsub.f32 -inf, %v1902_v15  ;;  %v1053_v10 = vor.u32 1.1754944e-38, %v1052_v44 }
 0x291   :  { %v2131_v35 = vpop.eup %1507  ;;  %v2134_v24 = vadd.f32 %v732_v54, %v2125_v48 }
 0x292   :  { %v1042_v16 = vmul.f32 %v2131_v35, %v2108_v46  ;;  %v883_v47 = vadd.f32 %v856_v27, %v2047_v32  ;;  %v857_v42 = vpop.f32.mrf.mxu0  ;;  %v1510_v28 = vpop.eup %1509  ;;  %v1035_v32 = vand.u32 2147483647, %v2082_v25  ;;  %v1034_v38 = vsel %vm2147_vm6, %v2105_v59, %v1030_v19 }
 0x293   :  { %1511 = vrcp.f32 %v2134_v24  ;;  %v2151_v34 = vmul.f32 0.0, %v1510_v28  ;;  %v581_v25 = vmul.f32 1.442695, %v551_v62  ;;  %vm1047_vm8 = vweird.f32 %v2131_v35 }
 0x294   :  { %v1043_v40 = vsub.f32 1.0, %v1042_v16  ;;  %v1025_v53 = vmul.f32 %v1024_v22, %v883_v47  ;;  %1513 = vpow2.f32 %v579_v23  ;;  %vm1036_vm7 = vcmp.eq.f32.partialorder %v1035_v32, 8.507059e+37  ;;  %vm2173_vm10 = vmor %vm1046_vm9, %vm1047_vm8 }
 0x295   :  { %v1039_v50 = vsel %vm1036_vm7, %v1038_v4, %v1034_v38  ;;  %v583_v57 = vmul.f32 1.442695, %v552_v52  ;;  %v1067_v23 = vand.u32 2147483648, %v2134_v24  ;;  %vm1061_vm13 = vweird.f32 %v2134_v24 }
 0x296   :  { %v1139_v20 = vadd.f32 %v1690_v55, %v1025_v53  ;;  %v1044_v55 = vmul.f32 %v2131_v35, %v1043_v40 }
 0x297   :  { %v808_v0 = vpop.f32.mrf.mxu3  ;;  %v1068_v62 = vor.u32 1.1754944e-38, %v1067_v23 }
 0x298   :  { %1155 = vst [vmem:[#allocation8 + $0x40] sm:$0xff] %v1139_v20  ;;  %v858_v43 = vadd.f32 %v857_v42, %v808_v0  ;;  %v735_v31 = vpop.xlane.xlu1 %734  ;;  %v1045_v14 = vadd.f32 %v2131_v35, %v1044_v55 }
 0x299   :  { %v2157_v41 = vpop.eup %1511  ;;  %v2160_v3 = vadd.f32 %v735_v31, %v2151_v34 }
 0x29a   :  { %v1057_v21 = vmul.f32 %v2157_v41, %v2134_v24  ;;  %v884_v8 = vadd.f32 %v858_v43, %v2073_v12  ;;  %v860_v39 = vpop.f32.mrf.mxu0  ;;  %v1514_v59 = vpop.eup %1513  ;;  %v1050_v12 = vand.u32 2147483647, %v2108_v46  ;;  %v1049_v18 = vsel %vm2173_vm10, %v2131_v35, %v1045_v14 }
 0x29b   :  { %1515 = vrcp.f32 %v2160_v3  ;;  %v2177_v26 = vmul.f32 0.0, %v1514_v59  ;;  %vm1062_vm12 = vweird.f32 %v2157_v41  ;;  %v1082_v31 = vand.u32 2147483648, %v2160_v3 }
 0x29c   :  { %v1058_v36 = vsub.f32 1.0, %v1057_v21  ;;  %v1040_v17 = vmul.f32 %v1039_v50, %v884_v8  ;;  %1517 = vpow2.f32 %v581_v25  ;;  %vm1051_vm11 = vcmp.eq.f32.partialorder %v1050_v12, 8.507059e+37  ;;  %vm1063_vm14 = vmor %vm1061_vm13, %vm1062_vm12 }
 0x29d   :  { %v1054_v54 = vsel %vm1051_vm11, %v1053_v10, %v1049_v18  ;;  %vm1076_vm1 = vweird.f32 %v2160_v3  ;;  %v1083_v59 = vor.u32 1.1754944e-38, %v1082_v31 }
 0x29e   :  { %v1140_v13 = vadd.f32 %v1692_v56, %v1040_v17  ;;  %v1059_v56 = vmul.f32 %v2157_v41, %v1058_v36 }
 0x29f   :  { %v811_v29 = vpop.f32.mrf.mxu3 }
 0x2a0   :  { %1156 = vst [vmem:[#allocation8 + $0x48] sm:$0xff] %v1140_v13  ;;  %v861_v33 = vadd.f32 %v860_v39, %v811_v29  ;;  %v738_v15 = vpop.xlane.xlu2 %737  ;;  %v1060_v58 = vadd.f32 %v2157_v41, %v1059_v56 }
 0x2a1   :  { %v1516_v7 = vpop.eup %1515  ;;  %v2184_v46 = vadd.f32 %v738_v15, %v2177_v26 }
 0x2a2   :  { %v1072_v37 = vmul.f32 %v1516_v7, %v2160_v3  ;;  %v885_v49 = vadd.f32 %v861_v33, %v2099_v45  ;;  %v862_v27 = vpop.f32.mrf.mxu0  ;;  %v1518_v11 = vpop.eup %1517  ;;  %v1065_v45 = vand.u32 2147483647, %v2134_v24  ;;  %v1064_v22 = vsel %vm1063_vm14, %v2157_v41, %v1060_v58 }
 0x2a3   :  { %1519 = vrcp.f32 %v2184_v46  ;;  %v2195_v42 = vmul.f32 0.0, %v1518_v11  ;;  %vm1077_vm0 = vweird.f32 %v1516_v7  ;;  %v1080_v41 = vand.u32 2147483647, %v2160_v3 }
 0x2a4   :  { %v1073_v51 = vsub.f32 1.0, %v1072_v37  ;;  %v1055_v35 = vmul.f32 %v1054_v54, %v885_v49  ;;  %1521 = vpow2.f32 %v583_v57  ;;  %vm1066_vm15 = vcmp.eq.f32.partialorder %v1065_v45, 8.507059e+37  ;;  %vm1078_vm2 = vmor %vm1076_vm1, %vm1077_vm0 }
 0x2a5   :  { %v1069_v32 = vsel %vm1066_vm15, %v1068_v62, %v1064_v22  ;;  %vm1081_vm3 = vcmp.eq.f32.partialorder %v1080_v41, 8.507059e+37  ;;  %v1097_v12 = vand.u32 2147483648, %v2184_v46  ;;  %vm1091_vm5 = vweird.f32 %v2184_v46 }
 0x2a6   :  { %v1141_v16 = vadd.f32 %v1696_v60, %v1055_v35  ;;  %v1074_v53 = vmul.f32 %v1516_v7, %v1073_v51  ;;  %v1095_v30 = vand.u32 2147483647, %v2184_v46 }
 0x2a7   :  { %v813_v47 = vpop.f32.mrf.mxu3 }
 0x2a8   :  { %1157 = vst [vmem:[#allocation8 + $0x50] sm:$0xff] %v1141_v16  ;;  %v863_v28 = vadd.f32 %v862_v27, %v813_v47  ;;  %v741_v40 = vpop.xlane.xlu0 %740  ;;  %v1075_v38 = vadd.f32 %v1516_v7, %v1074_v53  ;;  %vm1096_vm7 = vcmp.eq.f32.partialorder %v1095_v30, 8.507059e+37 }
 0x2a9   :  { %v1520_v19 = vpop.eup %1519  ;;  %v2199_v9 = vadd.f32 %v741_v40, %v2195_v42 }
 0x2aa   :  { %v1087_v60 = vmul.f32 %v1520_v19, %v2184_v46  ;;  %v886_v24 = vadd.f32 %v863_v28, %v2125_v48  ;;  %v865_v20 = vpop.f32.mrf.mxu0  ;;  %v1522_v0 = vpop.eup %1521  ;;  %v1079_v21 = vsel %vm1078_vm2, %v1516_v7, %v1075_v38  ;;  %vm1092_vm4 = vweird.f32 %v1520_v19 }
 0x2ab   :  { %1523 = vrcp.f32 %v2199_v9  ;;  %v2208_v48 = vmul.f32 0.0, %v1522_v0  ;;  %v1084_v14 = vsel %vm1081_vm3, %v1083_v59, %v1079_v21  ;;  %vm1093_vm6 = vmor %vm1091_vm5, %vm1092_vm4  ;;  %v1098_v7 = vor.u32 1.1754944e-38, %v1097_v12 }
 0x2ac   :  { %v1088_v63 = vsub.f32 1.0, %v1087_v60  ;;  %v1070_v43 = vmul.f32 %v1069_v32, %v886_v24  ;;  %v1112_v46 = vand.u32 2147483648, %v2199_v9  ;;  %vm1106_vm9 = vweird.f32 %v2199_v9 }
 0x2ad   :  { %v1110_v51 = vand.u32 2147483647, %v2199_v9 }
 0x2ae   :  { %v1142_v55 = vadd.f32 %v1698_v61, %v1070_v43  ;;  %v1089_v39 = vmul.f32 %v1520_v19, %v1088_v63  ;;  %v1113_v16 = vor.u32 1.1754944e-38, %v1112_v46 }
 0x2af   :  { %v816_v25 = vpop.f32.mrf.mxu3  ;;  %vm1111_vm11 = vcmp.eq.f32.partialorder %v1110_v51, 8.507059e+37 }
 0x2b0   :  { %1158 = vst [vmem:[#allocation8 + $0x58] sm:$0xff] %v1142_v55  ;;  %v866_v4 = vadd.f32 %v865_v20, %v816_v25  ;;  %v744_v8 = vpop.xlane.xlu1 %743  ;;  %v1090_v13 = vadd.f32 %v1520_v19, %v1089_v39 }
 0x2b1   :  { %v1524_v50 = vpop.eup %1523  ;;  %v760_v36 = vadd.f32 %v744_v8, %v2208_v48 }
 0x2b2   :  { %v1102_v17 = vmul.f32 %v1524_v50, %v2199_v9  ;;  %v887_v61 = vadd.f32 %v866_v4, %v2151_v34  ;;  %v867_v3 = vpop.f32.mrf.mxu0  ;;  %v1094_v18 = vsel %vm1093_vm6, %v1520_v19, %v1090_v13  ;;  %vm1107_vm8 = vweird.f32 %v1524_v50 }
 0x2b3   :  { %1525 = vrcp.f32 %v760_v36  ;;  %v1099_v37 = vsel %vm1096_vm7, %v1098_v7, %v1094_v18  ;;  %vm1108_vm10 = vmor %vm1106_vm9, %vm1107_vm8  ;;  %v1127_v40 = vand.u32 2147483648, %v760_v36  ;;  %vm1121_vm13 = vweird.f32 %v760_v36 }
 0x2b4   :  { %v1103_v44 = vsub.f32 1.0, %v1102_v17  ;;  %v1085_v52 = vmul.f32 %v1084_v14, %v887_v61  ;;  %v1125_v53 = vand.u32 2147483647, %v760_v36 }
 0x2b5   :  { %v1128_v24 = vor.u32 1.1754944e-38, %v1127_v40 }
 0x2b6   :  { %v1143_v29 = vadd.f32 %v1702_v1, %v1085_v52  ;;  %v1104_v15 = vmul.f32 %v1524_v50, %v1103_v44  ;;  %vm1126_vm15 = vcmp.eq.f32.partialorder %v1125_v53, 8.507059e+37 }
 0x2b7   :  { %v818_v33 = vpop.f32.mrf.mxu3 }
 0x2b8   :  { %1159 = vst [vmem:[#allocation8 + $0x60] sm:$0xff] %v1143_v29  ;;  %v868_v34 = vadd.f32 %v867_v3, %v818_v33  ;;  %v1105_v1 = vadd.f32 %v1524_v50, %v1104_v15 }
 0x2b9   :  { %v1526_v56 = vpop.eup %1525 }
 0x2ba   :  { %v1117_v10 = vmul.f32 %v1526_v56, %v760_v36  ;;  %v888_v57 = vadd.f32 %v868_v34, %v2177_v26  ;;  %v870_v11 = vpop.f32.mrf.mxu0  ;;  %v1109_v26 = vsel %vm1108_vm10, %v1524_v50, %v1105_v1  ;;  %vm1122_vm12 = vweird.f32 %v1526_v56 }
 0x2bb   :  { %v1114_v47 = vsel %vm1111_vm11, %v1113_v16, %v1109_v26  ;;  %vm1123_vm14 = vmor %vm1121_vm13, %vm1122_vm12 }
 0x2bc   :  { %v1118_v49 = vsub.f32 1.0, %v1117_v10  ;;  %v1100_v27 = vmul.f32 %v1099_v37, %v888_v57 }
 0x2be   :  { %v1144_v54 = vadd.f32 %v1704_v2, %v1100_v27  ;;  %v1119_v23 = vmul.f32 %v1526_v56, %v1118_v49 }
 0x2bf   :  { %v821_v35 = vpop.f32.mrf.mxu3 }
 0x2c0   :  { %1160 = vst [vmem:[#allocation8 + $0x68] sm:$0xff] %v1144_v54  ;;  %v871_v58 = vadd.f32 %v870_v11, %v821_v35  ;;  %v1120_v22 = vadd.f32 %v1526_v56, %v1119_v23 }
 0x2c2   :  { %v889_v45 = vadd.f32 %v871_v58, %v2195_v42  ;;  %v872_v19 = vpop.f32.mrf.mxu0  ;;  %v1124_v60 = vsel %vm1123_vm14, %v1526_v56, %v1120_v22 }
 0x2c3   :  { %v1129_v42 = vsel %vm1126_vm15, %v1128_v24, %v1124_v60 }
 0x2c4   :  { %v1115_v28 = vmul.f32 %v1114_v47, %v889_v45 }
 0x2c6   :  { %v1145_v2 = vadd.f32 %v1708_v5, %v1115_v28 }
 0x2c7   :  { %v823_v62 = vpop.f32.mrf.mxu3 }
 0x2c8   :  { %1161 = vst [vmem:[#allocation8 + $0x70] sm:$0xff] %v1145_v2  ;;  %v873_v9 = vadd.f32 %v872_v19, %v823_v62 }
 0x2ca   :  { %v890_v20 = vadd.f32 %v873_v9, %v2208_v48 }
 0x2cc   :  { %v1130_v5 = vmul.f32 %v1129_v42, %v890_v20 }
 0x2ce   :  { %v1146_v32 = vadd.f32 %v1710_v6, %v1130_v5 }
 0x2d0   :  { %1162 = vst [vmem:[#allocation8 + $0x78] sm:$0xff] %v1146_v32 }
 0x2d1   :  { %1175 = dma.vmem_to_hbm [thread:$0]  %s1168_s2, 2048, %s1170_s30, [#allocation4], %s1635_s4, %s1635_s4, %s1636_s5  }
 0x2d2   :  { %1627 = dma.done.wait [#allocation4], 2048  }
 0x2d3   :  { %1628 = vsyncadd [#allocation4], 4294965248 }
 0x2d4   :  { %1180 = vsyncpa [#allocation3], 1 }
 0x2d5   :  { %1181 = vsyncpa [#allocation6], 1 }
 0x2d6   :  { %1182 = vsyncpa [#allocation4], 1 }

</bundles_post_ra>
